<compile_context>
chip_gen: v7x
topology: tpu7x:2x2x1
jax: 0.10.0
libtpu: 0.0.40
codegen_flags: <defaults>
</compile_context>

<pallas_src>
import jax
import jax.numpy as jnp
from jax.experimental import pallas as pl
from jax.experimental.pallas import tpu as pltpu

EPS = 1e-5  # PyTorch InstanceNorm2d default


def _round_up(x, m):
    return (x + m - 1) // m * m


def _vmem_limit_bytes():
    """Per-generation scoped-VMEM request (leave headroom below physical)."""
    try:
        info = pltpu.get_tpu_info()
        cap = getattr(info, "vmem_capacity_bytes", None)
        if cap:
            # ~75% of physical: ~48 MiB on v7x (64 MiB), capped at 96 MiB on
            # v5e/v6e (128 MiB).
            return int(min(cap * 3 // 4, 96 * 1024 * 1024))
    except Exception:
        pass
    return 32 * 1024 * 1024  # safe scoped default on every generation


def conv_layer_forward(x, weight, bias, *, kernel_size, stride=1, dilation=1,
                       tile=8192, matmul_dtype=jnp.bfloat16):
    """ReflectionPad2d -> Conv2d -> InstanceNorm2d(affine=False) -> ReLU.

    x: [N, C_in, H, W] (NCHW), weight: [C_out, C_in, K, K], bias: [C_out].
    """
    if stride != 1:
        # TODO(synk): stride > 1 needs a strided flat layout; the reference
        # ConvLayer config exercised here uses stride=1 (groups=1, norm='in',
        # nonlinear='relu').
        raise NotImplementedError("Pallas ConvLayer kernel supports stride=1 only")

    N, C_in, H, W = x.shape
    C_out = weight.shape[0]
    K = kernel_size
    d = dilation
    KK = K * K

    pad = (K + (d - 1) * (K - 1)) // 2
    eff_k = (K - 1) * d + 1

    # ReflectionPad2d (wrapper glue).
    xp = jnp.pad(x, ((0, 0), (0, 0), (pad, pad), (pad, pad)), mode="reflect")
    Hp, Wp = H + 2 * pad, W + 2 * pad
    H_out = Hp - eff_k + 1
    W_out = Wp - eff_k + 1

    # Flat-spatial layout: output pixel (i, j) lives at flat index p = i*Wp + j;
    # conv tap (kh, kw) reads the padded input at p + (kh*d*Wp + kw*d).
    Lv = (H_out - 1) * Wp + W_out          # flat range covering all valid outputs
    Lout = H_out * Wp                      # flat length that reshapes to (H_out, Wp)
    halo = (K - 1) * d * (Wp + 1)          # largest tap offset
    Hh = _round_up(max(halo, 1), 128)      # halo block size (lane multiple of 128)

    C_in_p = _round_up(C_in, 8)            # sublane-aligned channel count
    itemsize = jnp.dtype(matmul_dtype).itemsize
    vmem_limit = _vmem_limit_bytes()

    # Spatial tile T (multiple of Hh, hence of 128): start big, shrink until the
    # per-step VMEM estimate fits comfortably inside the scoped limit.
    T = _round_up(min(_round_up(Lout, 128), max(tile, 128)), Hh)

    def _step_vmem_bytes(t):
        return (2 * C_in_p * (t + Hh) * itemsize      # double-buffered x body+halo
                + 2 * C_out * t * itemsize            # double-buffered y output
                + 2 * t * 4                           # double-buffered mask
                + C_in_p * (t + Hh) * itemsize        # window scratch
                + KK * C_in_p * t * itemsize          # tap-stack scratch
                + 2 * C_out * t * 4)                  # f32 conv value headroom

    budget = int(vmem_limit * 0.45)
    while T > Hh and _step_vmem_bytes(T) > budget:
        T = max(Hh, (T // 2) // Hh * Hh)

    Lpad = _round_up(Lout, T)
    n_tiles = Lpad // T
    T_over_Hh = T // Hh

    # 2-way split of the stats reduction: a megacore-parallel axis on v7x
    # (harmless sequential axis on single-TC v5e/v6e).
    P = 2 if (n_tiles % 2 == 0 and n_tiles >= 2) else 1
    tpp = n_tiles // P

    inv_cnt = 1.0 / float(H_out * W_out)
    out_dtype = x.dtype

    # ---- wrapper-side prep (single flat pad, no overlapping-tile copies) -----
    Lflat = max(Lpad + Hh, Hp * Wp)
    xflat = xp.reshape(N, C_in, Hp * Wp).astype(matmul_dtype)
    xflat = jnp.pad(xflat, ((0, 0), (0, C_in_p - C_in), (0, Lflat - Hp * Wp)))

    # Folded conv weights: columns ordered (kh, kw, c) with channel padding.
    w_k = jnp.transpose(weight, (0, 2, 3, 1))                  # [C_out, K, K, C_in]
    w_k = jnp.pad(w_k, ((0, 0), (0, 0), (0, 0), (0, C_in_p - C_in)))
    w_fold = w_k.reshape(C_out, KK * C_in_p).astype(matmul_dtype)
    b_col = bias.reshape(C_out, 1).astype(jnp.float32)         # [C_out, 1]

    # Validity mask for InstanceNorm stats (flat index >= Lv or column >= W_out
    # are garbage lanes).
    # TODO(synk): derive in-kernel from broadcasted_iota to drop this small
    # HBM stream entirely.
    p_idx = jnp.arange(Lpad, dtype=jnp.int32)
    valid = (p_idx < Lv) & ((p_idx % Wp) < W_out)
    mask = valid.astype(jnp.float32).reshape(1, Lpad)          # [1, Lpad]

    offs = tuple(kh * d * Wp + kw * d for kh in range(K) for kw in range(K))

    # ------------------ pass 1: conv (folded matmul) + stats ------------------
    def conv_stats_kernel(xb_ref, xh_ref, w_ref, b_ref, m_ref,
                          y_ref, s1_ref, s2_ref, win_ref, stack_ref):
        t = pl.program_id(2)
        # Rebuild the halo'd window once in VMEM (aligned stores only), then
        # copy the K*K lane-shifted taps into the stacked matmul operand.
        # TODO(synk): on v5e, derive the lane shifts with pltpu.roll (XLU) if
        # the load/store slots saturate.
        win_ref[:, :T] = xb_ref[0]
        win_ref[:, T:] = xh_ref[0]
        for k, off in enumerate(offs):                         # static unroll
            stack_ref[k * C_in_p:(k + 1) * C_in_p, :] = win_ref[:, off:off + T]

        conv = jnp.dot(w_ref[...], stack_ref[...],
                       preferred_element_type=jnp.float32)     # [C_out, T] f32
        y_ref[0] = (conv + b_ref[...]).astype(y_ref.dtype)

        # Bias-shifted moments: the bias cancels in the variance, avoiding
        # catastrophic cancellation in E[y^2] - mean^2.
        cm = conv * m_ref[...]
        s1 = jnp.sum(cm, axis=1, keepdims=True)                # [C_out, 1]
        s2 = jnp.sum(cm * conv, axis=1, keepdims=True)         # [C_out, 1]

        @pl.when(t == 0)
        def _():
            s1_ref[...] = jnp.zeros_like(s1_ref)
            s2_ref[...] = jnp.zeros_like(s2_ref)

        s1_ref[0, 0] += s1
        s2_ref[0, 0] += s2

    xb_spec = pl.BlockSpec((1, C_in_p, T), lambda n, p, t: (n, 0, p * tpp + t))
    xh_spec = pl.BlockSpec((1, C_in_p, Hh),
                           lambda n, p, t: (n, 0, (p * tpp + t + 1) * T_over_Hh))
    w_spec = pl.BlockSpec((C_out, KK * C_in_p), lambda n, p, t: (0, 0))
    b_spec = pl.BlockSpec((C_out, 1), lambda n, p, t: (0, 0))
    m_spec = pl.BlockSpec((1, T), lambda n, p, t: (0, p * tpp + t))
    y_spec = pl.BlockSpec((1, C_out, T), lambda n, p, t: (n, 0, p * tpp + t))
    st_spec = pl.BlockSpec((1, 1, C_out, 1), lambda n, p, t: (n, p, 0, 0))

    y, s1p, s2p = pl.pallas_call(
        conv_stats_kernel,
        out_shape=(jax.ShapeDtypeStruct((N, C_out, Lpad), matmul_dtype),
                   jax.ShapeDtypeStruct((N, P, C_out, 1), jnp.float32),
                   jax.ShapeDtypeStruct((N, P, C_out, 1), jnp.float32)),
        grid_spec=pltpu.PrefetchScalarGridSpec(
            num_scalar_prefetch=0,
            grid=(N, P, tpp),
            in_specs=[xb_spec, xh_spec, w_spec, b_spec, m_spec],
            out_specs=[y_spec, st_spec, st_spec],
            scratch_shapes=[pltpu.VMEM((C_in_p, T + Hh), matmul_dtype),
                            pltpu.VMEM((KK * C_in_p, T), matmul_dtype)]),
        compiler_params=pltpu.CompilerParams(
            dimension_semantics=("parallel", "parallel", "arbitrary"),
            vmem_limit_bytes=vmem_limit),
    )(xflat, xflat, w_fold, b_col, mask)

    # Combine the P partial stats (tiny wrapper-side reduction).
    s1 = jnp.sum(s1p, axis=1)              # [N, C_out, 1]
    s2 = jnp.sum(s2p, axis=1)              # [N, C_out, 1]

    # --------------------- pass 2: normalize + ReLU (no conv) -----------------
    def norm_relu_kernel(y_ref, b_ref, s1_ref, s2_ref, o_ref):
        mean_c = s1_ref[0] * inv_cnt                            # mean of pre-bias conv
        var = jnp.maximum(s2_ref[0] * inv_cnt - mean_c * mean_c, 0.0)
        inv_std = jax.lax.rsqrt(var + EPS)                      # EUP slot
        mean_y = mean_c + b_ref[...]                            # full mean incl. bias
        yv = y_ref[0].astype(jnp.float32)
        o_ref[0] = jnp.maximum((yv - mean_y) * inv_std, 0.0).astype(o_ref.dtype)

    y2_spec = pl.BlockSpec((1, C_out, T), lambda n, t: (n, 0, t))
    b2_spec = pl.BlockSpec((C_out, 1), lambda n, t: (0, 0))
    stat_in_spec = pl.BlockSpec((1, C_out, 1), lambda n, t: (n, 0, 0))
    o_spec = pl.BlockSpec((1, C_out, T), lambda n, t: (n, 0, t))

    out_flat = pl.pallas_call(
        norm_relu_kernel,
        out_shape=jax.ShapeDtypeStruct((N, C_out, Lpad), out_dtype),
        grid_spec=pltpu.PrefetchScalarGridSpec(
            num_scalar_prefetch=0,
            grid=(N, n_tiles),
            in_specs=[y2_spec, b2_spec, stat_in_spec, stat_in_spec],
            out_specs=o_spec),
        compiler_params=pltpu.CompilerParams(
            dimension_semantics=("parallel", "parallel"),
            vmem_limit_bytes=vmem_limit),
    )(y, b_col, s1, s2)

    # Epilogue: slice + free reshape + slice (no transpose, no pad).
    out = out_flat[:, :, :Lout].reshape(N, C_out, H_out, Wp)[:, :, :, :W_out]
    return out


def _reference_forward(x, weight, bias, *, kernel_size, stride=1, dilation=1):
    """Pure-JAX reference: reflect-pad -> conv -> InstanceNorm -> ReLU."""
    pad = (kernel_size + (dilation - 1) * (kernel_size - 1)) // 2
    xp = jnp.pad(x, ((0, 0), (0, 0), (pad, pad), (pad, pad)), mode="reflect")
    y = jax.lax.conv_general_dilated(
        xp, weight, window_strides=(stride, stride), padding="VALID",
        rhs_dilation=(dilation, dilation),
        dimension_numbers=("NCHW", "OIHW", "NCHW"),
        precision=jax.lax.Precision.HIGHEST,
        preferred_element_type=jnp.float32)
    y = y + bias.reshape(1, -1, 1, 1)
    mean = y.mean(axis=(2, 3), keepdims=True)
    var = y.var(axis=(2, 3), keepdims=True)   # biased, matches InstanceNorm2d
    y = (y - mean) * jax.lax.rsqrt(var + EPS)
    return jnp.maximum(y, 0.0)


if __name__ == "__main__":
    # ConvLayer(4, 8, kernel_size=3, stride=1) at small shapes.
    N, C_in, H, W = 2, 4, 16, 16
    C_out, K = 8, 3

    key = jax.random.PRNGKey(0)
    kx, kw, kb = jax.random.split(key, 3)
    x = jax.random.normal(kx, (N, C_in, H, W), dtype=jnp.float32)
    fan_in = C_in * K * K
    weight = jax.random.normal(kw, (C_out, C_in, K, K), dtype=jnp.float32) / jnp.sqrt(fan_in)
    bias = jax.random.normal(kb, (C_out,), dtype=jnp.float32) * 0.1

    ref = _reference_forward(x, weight, bias, kernel_size=K, stride=1, dilation=1)

    # f32 path: tight check against the pure-JAX reference.
    out_f32 = conv_layer_forward(x, weight, bias, kernel_size=K, stride=1,
                                 dilation=1, matmul_dtype=jnp.float32)
    out_f32 = jax.block_until_ready(out_f32)
    assert out_f32.shape == (N, C_out, H, W), out_f32.shape
    err_f32 = float(jnp.max(jnp.abs(out_f32 - ref)))
    assert err_f32 < 2e-3, f"f32 path max |err| vs reference = {err_f32}"

    # bf16 performance path: structural checks + loose-tolerance comparison.
    out_bf16 = conv_layer_forward(x, weight, bias, kernel_size=K, stride=1,
                                  dilation=1, matmul_dtype=jnp.bfloat16)
    out_bf16 = jax.block_until_ready(out_bf16)
    assert out_bf16.shape == (N, C_out, H, W), out_bf16.shape
    assert bool(jnp.all(jnp.isfinite(out_bf16))), "non-finite output"
    assert bool(jnp.all(out_bf16 >= 0.0)), "ReLU output must be non-negative"
    err_bf16 = float(jnp.max(jnp.abs(out_bf16.astype(jnp.float32) - ref)))
    assert err_bf16 < 1.5e-1, f"bf16 path max |err| vs reference = {err_bf16}"

    print("KERNEL_OK")
</pallas_src>

<mosaic_0001>
module attributes {stable_mosaic.version = 11 : i64} {
  func.func @conv_stats_kernel(%arg0: i32, %arg1: i32, %arg2: i32, %arg3: memref<1x8x384xf32, #tpu.memory_space<vmem>>, %arg4: memref<1x8x128xf32, #tpu.memory_space<vmem>>, %arg5: memref<8x72xf32, #tpu.memory_space<vmem>>, %arg6: memref<8x1xf32, #tpu.memory_space<vmem>>, %arg7: memref<1x384xf32, #tpu.memory_space<vmem>>, %arg8: memref<1x8x384xf32, #tpu.memory_space<vmem>>, %arg9: memref<1x1x8x1xf32, #tpu.memory_space<vmem>>, %arg10: memref<1x1x8x1xf32, #tpu.memory_space<vmem>>, %arg11: memref<8x512xf32, #tpu.memory_space<vmem>>, %arg12: memref<72x384xf32, #tpu.memory_space<vmem>>) attributes {dimension_semantics = [#tpu.dimension_semantics<parallel>, #tpu.dimension_semantics<parallel>, #tpu.dimension_semantics<arbitrary>], iteration_bounds = array<i64: 2, 1, 1>, scalar_prefetch = 0 : i64, scratch_operands = 2 : i64, tpu.core_type = #tpu.core_type<tc>, window_params = [{transform_indices = @transform_0, window_bounds = array<i64: 1, 8, 384>}, {transform_indices = @transform_1, window_bounds = array<i64: 1, 8, 128>}, {pipeline_mode = #tpu.pipeline_mode<synchronous>, transform_indices = @transform_2, window_bounds = array<i64: 8, 72>}, {pipeline_mode = #tpu.pipeline_mode<synchronous>, transform_indices = @transform_3, window_bounds = array<i64: 8, 1>}, {transform_indices = @transform_4, window_bounds = array<i64: 1, 384>}, {transform_indices = @transform_5, window_bounds = array<i64: 1, 8, 384>}, {transform_indices = @transform_6, window_bounds = array<i64: 1, 1, 8, 1>}, {transform_indices = @transform_7, window_bounds = array<i64: 1, 1, 8, 1>}]} {
    %c0 = arith.constant 0 : index
    %c0_0 = arith.constant 0 : index
    %c0_1 = arith.constant 0 : index
    %0 = vector.load %arg3[%c0, %c0_0, %c0_1] : memref<1x8x384xf32, #tpu.memory_space<vmem>>, vector<1x8x384xf32>
    %1 = vector.shape_cast %0 : vector<1x8x384xf32> to vector<8x384xf32>
    %c0_2 = arith.constant 0 : index
    %c0_3 = arith.constant 0 : index
    %2 = vector.load %arg11[%c0_2, %c0_3] : memref<8x512xf32, #tpu.memory_space<vmem>>, vector<8x384xf32>
    tpu.vector_store %arg11[%c0_2, %c0_3], %1 {strides = array<i32>} : memref<8x512xf32, #tpu.memory_space<vmem>>, vector<8x384xf32>,
    %c0_4 = arith.constant 0 : index
    %c0_5 = arith.constant 0 : index
    %c0_6 = arith.constant 0 : index
    %3 = vector.load %arg4[%c0_4, %c0_5, %c0_6] : memref<1x8x128xf32, #tpu.memory_space<vmem>>, vector<1x8x128xf32>
    %4 = vector.shape_cast %3 : vector<1x8x128xf32> to vector<8x128xf32>
    %c0_7 = arith.constant 0 : index
    %c384 = arith.constant 384 : index
    %5 = vector.load %arg11[%c0_7, %c384] : memref<8x512xf32, #tpu.memory_space<vmem>>, vector<8x128xf32>
    tpu.vector_store %arg11[%c0_7, %c384], %4 {strides = array<i32>} : memref<8x512xf32, #tpu.memory_space<vmem>>, vector<8x128xf32>,
    %c0_8 = arith.constant 0 : index
    %c0_9 = arith.constant 0 : index
    %6 = vector.load %arg11[%c0_8, %c0_9] : memref<8x512xf32, #tpu.memory_space<vmem>>, vector<8x384xf32>
    %c0_10 = arith.constant 0 : index
    %c0_11 = arith.constant 0 : index
    %7 = vector.load %arg12[%c0_10, %c0_11] : memref<72x384xf32, #tpu.memory_space<vmem>>, vector<8x384xf32>
    tpu.vector_store %arg12[%c0_10, %c0_11], %6 {strides = array<i32>} : memref<72x384xf32, #tpu.memory_space<vmem>>, vector<8x384xf32>,
    %c0_12 = arith.constant 0 : index
    %c1 = arith.constant 1 : index
    %8 = vector.load %arg11[%c0_12, %c1] : memref<8x512xf32, #tpu.memory_space<vmem>>, vector<8x384xf32>
    %c8 = arith.constant 8 : index
    %c0_13 = arith.constant 0 : index
    %9 = vector.load %arg12[%c8, %c0_13] : memref<72x384xf32, #tpu.memory_space<vmem>>, vector<8x384xf32>
    tpu.vector_store %arg12[%c8, %c0_13], %8 {strides = array<i32>} : memref<72x384xf32, #tpu.memory_space<vmem>>, vector<8x384xf32>,
    %c0_14 = arith.constant 0 : index
    %c2 = arith.constant 2 : index
    %10 = vector.load %arg11[%c0_14, %c2] : memref<8x512xf32, #tpu.memory_space<vmem>>, vector<8x384xf32>
    %c16 = arith.constant 16 : index
    %c0_15 = arith.constant 0 : index
    %11 = vector.load %arg12[%c16, %c0_15] : memref<72x384xf32, #tpu.memory_space<vmem>>, vector<8x384xf32>
    tpu.vector_store %arg12[%c16, %c0_15], %10 {strides = array<i32>} : memref<72x384xf32, #tpu.memory_space<vmem>>, vector<8x384xf32>,
    %c0_16 = arith.constant 0 : index
    %c18 = arith.constant 18 : index
    %12 = vector.load %arg11[%c0_16, %c18] : memref<8x512xf32, #tpu.memory_space<vmem>>, vector<8x384xf32>
    %c24 = arith.constant 24 : index
    %c0_17 = arith.constant 0 : index
    %13 = vector.load %arg12[%c24, %c0_17] : memref<72x384xf32, #tpu.memory_space<vmem>>, vector<8x384xf32>
    tpu.vector_store %arg12[%c24, %c0_17], %12 {strides = array<i32>} : memref<72x384xf32, #tpu.memory_space<vmem>>, vector<8x384xf32>,
    %c0_18 = arith.constant 0 : index
    %c19 = arith.constant 19 : index
    %14 = vector.load %arg11[%c0_18, %c19] : memref<8x512xf32, #tpu.memory_space<vmem>>, vector<8x384xf32>
    %c32 = arith.constant 32 : index
    %c0_19 = arith.constant 0 : index
    %15 = vector.load %arg12[%c32, %c0_19] : memref<72x384xf32, #tpu.memory_space<vmem>>, vector<8x384xf32>
    tpu.vector_store %arg12[%c32, %c0_19], %14 {strides = array<i32>} : memref<72x384xf32, #tpu.memory_space<vmem>>, vector<8x384xf32>,
    %c0_20 = arith.constant 0 : index
    %c20 = arith.constant 20 : index
    %16 = vector.load %arg11[%c0_20, %c20] : memref<8x512xf32, #tpu.memory_space<vmem>>, vector<8x384xf32>
    %c40 = arith.constant 40 : index
    %c0_21 = arith.constant 0 : index
    %17 = vector.load %arg12[%c40, %c0_21] : memref<72x384xf32, #tpu.memory_space<vmem>>, vector<8x384xf32>
    tpu.vector_store %arg12[%c40, %c0_21], %16 {strides = array<i32>} : memref<72x384xf32, #tpu.memory_space<vmem>>, vector<8x384xf32>,
    %c0_22 = arith.constant 0 : index
    %c36 = arith.constant 36 : index
    %18 = vector.load %arg11[%c0_22, %c36] : memref<8x512xf32, #tpu.memory_space<vmem>>, vector<8x384xf32>
    %c48 = arith.constant 48 : index
    %c0_23 = arith.constant 0 : index
    %19 = vector.load %arg12[%c48, %c0_23] : memref<72x384xf32, #tpu.memory_space<vmem>>, vector<8x384xf32>
    tpu.vector_store %arg12[%c48, %c0_23], %18 {strides = array<i32>} : memref<72x384xf32, #tpu.memory_space<vmem>>, vector<8x384xf32>,
    %c0_24 = arith.constant 0 : index
    %c37 = arith.constant 37 : index
    %20 = vector.load %arg11[%c0_24, %c37] : memref<8x512xf32, #tpu.memory_space<vmem>>, vector<8x384xf32>
    %c56 = arith.constant 56 : index
    %c0_25 = arith.constant 0 : index
    %21 = vector.load %arg12[%c56, %c0_25] : memref<72x384xf32, #tpu.memory_space<vmem>>, vector<8x384xf32>
    tpu.vector_store %arg12[%c56, %c0_25], %20 {strides = array<i32>} : memref<72x384xf32, #tpu.memory_space<vmem>>, vector<8x384xf32>,
    %c0_26 = arith.constant 0 : index
    %c38 = arith.constant 38 : index
    %22 = vector.load %arg11[%c0_26, %c38] : memref<8x512xf32, #tpu.memory_space<vmem>>, vector<8x384xf32>
    %c64 = arith.constant 64 : index
    %c0_27 = arith.constant 0 : index
    %23 = vector.load %arg12[%c64, %c0_27] : memref<72x384xf32, #tpu.memory_space<vmem>>, vector<8x384xf32>
    tpu.vector_store %arg12[%c64, %c0_27], %22 {strides = array<i32>} : memref<72x384xf32, #tpu.memory_space<vmem>>, vector<8x384xf32>,
    %c0_28 = arith.constant 0 : index
    %c0_29 = arith.constant 0 : index
    %24 = vector.load %arg5[%c0_28, %c0_29] : memref<8x72xf32, #tpu.memory_space<vmem>>, vector<8x72xf32>
    %c0_30 = arith.constant 0 : index
    %c0_31 = arith.constant 0 : index
    %25 = vector.load %arg12[%c0_30, %c0_31] : memref<72x384xf32, #tpu.memory_space<vmem>>, vector<72x384xf32>
    %cst = arith.constant dense<0.000000e+00> : vector<8x384xf32>
    %26 = tpu.matmul %24, %25, %cst {dimension_numbers = #tpu.dot_dimension_numbers<[1], [0], [0], [1], [0, 0, 1, 1], [], []>} : vector<8x72xf32>, vector<72x384xf32>, vector<8x384xf32> -> vector<8x384xf32>
    %c0_32 = arith.constant 0 : index
    %c0_33 = arith.constant 0 : index
    %27 = vector.load %arg6[%c0_32, %c0_33] : memref<8x1xf32, #tpu.memory_space<vmem>>, vector<8x1xf32>
    %28 = vector.broadcast %27 : vector<8x1xf32> to vector<8x384xf32>
    %29 = arith.addf %26, %28 : vector<8x384xf32>
    %c0_34 = arith.constant 0 : index
    %c0_35 = arith.constant 0 : index
    %c0_36 = arith.constant 0 : index
    %30 = vector.load %arg8[%c0_34, %c0_35, %c0_36] : memref<1x8x384xf32, #tpu.memory_space<vmem>>, vector<1x8x384xf32>
    %31 = vector.shape_cast %30 : vector<1x8x384xf32> to vector<8x384xf32>
    %32 = vector.shape_cast %29 : vector<8x384xf32> to vector<1x8x384xf32>
    tpu.vector_store %arg8[%c0_34, %c0_35, %c0_36], %32 {strides = array<i32>} : memref<1x8x384xf32, #tpu.memory_space<vmem>>, vector<1x8x384xf32>,
    %c0_37 = arith.constant 0 : index
    %c0_38 = arith.constant 0 : index
    %33 = vector.load %arg7[%c0_37, %c0_38] : memref<1x384xf32, #tpu.memory_space<vmem>>, vector<1x384xf32>
    %34 = vector.broadcast %33 : vector<1x384xf32> to vector<8x384xf32>
    %35 = arith.mulf %26, %34 : vector<8x384xf32>
    %cst_39 = arith.constant dense<0.000000e+00> : vector<8xf32>
    %36 = vector.multi_reduction <add>, %35, %cst_39 [1] : vector<8x384xf32> to vector<8xf32>
    %37 = vector.shape_cast %36 : vector<8xf32> to vector<8x1xf32>
    %38 = arith.mulf %35, %26 : vector<8x384xf32>
    %cst_40 = arith.constant dense<0.000000e+00> : vector<8xf32>
    %39 = vector.multi_reduction <add>, %38, %cst_40 [1] : vector<8x384xf32> to vector<8xf32>
    %40 = vector.shape_cast %39 : vector<8xf32> to vector<8x1xf32>
    %c0_i32 = arith.constant 0 : i32
    %41 = arith.cmpi eq, %arg2, %c0_i32 : i32
    %42 = arith.extui %41 : i1 to i32
    %c0_i32_41 = arith.constant 0 : i32
    %43 = arith.cmpi ne, %42, %c0_i32_41 : i32
    scf.if %43 {
      %cst_58 = arith.constant 0.000000e+00 : f32
      %56 = vector.broadcast %cst_58 : f32 to vector<1x1x8x1xf32>
      %c0_59 = arith.constant 0 : index
      %c0_60 = arith.constant 0 : index
      %c0_61 = arith.constant 0 : index
      %c0_62 = arith.constant 0 : index
      %57 = vector.load %arg9[%c0_59, %c0_60, %c0_61, %c0_62] : memref<1x1x8x1xf32, #tpu.memory_space<vmem>>, vector<1x1x8x1xf32>
      tpu.vector_store %arg9[%c0_59, %c0_60, %c0_61, %c0_62], %56 {strides = array<i32>} : memref<1x1x8x1xf32, #tpu.memory_space<vmem>>, vector<1x1x8x1xf32>,
      %cst_63 = arith.constant 0.000000e+00 : f32
      %58 = vector.broadcast %cst_63 : f32 to vector<1x1x8x1xf32>
      %c0_64 = arith.constant 0 : index
      %c0_65 = arith.constant 0 : index
      %c0_66 = arith.constant 0 : index
      %c0_67 = arith.constant 0 : index
      %59 = vector.load %arg10[%c0_64, %c0_65, %c0_66, %c0_67] : memref<1x1x8x1xf32, #tpu.memory_space<vmem>>, vector<1x1x8x1xf32>
      tpu.vector_store %arg10[%c0_64, %c0_65, %c0_66, %c0_67], %58 {strides = array<i32>} : memref<1x1x8x1xf32, #tpu.memory_space<vmem>>, vector<1x1x8x1xf32>,
    } else {
    }
    %c0_42 = arith.constant 0 : index
    %c0_43 = arith.constant 0 : index
    %c0_44 = arith.constant 0 : index
    %c0_45 = arith.constant 0 : index
    %44 = vector.load %arg9[%c0_42, %c0_43, %c0_44, %c0_45] : memref<1x1x8x1xf32, #tpu.memory_space<vmem>>, vector<1x1x8x1xf32>
    %45 = vector.shape_cast %44 : vector<1x1x8x1xf32> to vector<8x1xf32>
    %46 = arith.addf %45, %37 : vector<8x1xf32>
    %c0_46 = arith.constant 0 : index
    %c0_47 = arith.constant 0 : index
    %c0_48 = arith.constant 0 : index
    %c0_49 = arith.constant 0 : index
    %47 = vector.load %arg9[%c0_46, %c0_47, %c0_48, %c0_49] : memref<1x1x8x1xf32, #tpu.memory_space<vmem>>, vector<1x1x8x1xf32>
    %48 = vector.shape_cast %47 : vector<1x1x8x1xf32> to vector<8x1xf32>
    %49 = vector.shape_cast %46 : vector<8x1xf32> to vector<1x1x8x1xf32>
    tpu.vector_store %arg9[%c0_46, %c0_47, %c0_48, %c0_49], %49 {strides = array<i32>} : memref<1x1x8x1xf32, #tpu.memory_space<vmem>>, vector<1x1x8x1xf32>,
    %c0_50 = arith.constant 0 : index
    %c0_51 = arith.constant 0 : index
    %c0_52 = arith.constant 0 : index
    %c0_53 = arith.constant 0 : index
    %50 = vector.load %arg10[%c0_50, %c0_51, %c0_52, %c0_53] : memref<1x1x8x1xf32, #tpu.memory_space<vmem>>, vector<1x1x8x1xf32>
    %51 = vector.shape_cast %50 : vector<1x1x8x1xf32> to vector<8x1xf32>
    %52 = arith.addf %51, %40 : vector<8x1xf32>
    %c0_54 = arith.constant 0 : index
    %c0_55 = arith.constant 0 : index
    %c0_56 = arith.constant 0 : index
    %c0_57 = arith.constant 0 : index
    %53 = vector.load %arg10[%c0_54, %c0_55, %c0_56, %c0_57] : memref<1x1x8x1xf32, #tpu.memory_space<vmem>>, vector<1x1x8x1xf32>
    %54 = vector.shape_cast %53 : vector<1x1x8x1xf32> to vector<8x1xf32>
    %55 = vector.shape_cast %52 : vector<8x1xf32> to vector<1x1x8x1xf32>
    tpu.vector_store %arg10[%c0_54, %c0_55, %c0_56, %c0_57], %55 {strides = array<i32>} : memref<1x1x8x1xf32, #tpu.memory_space<vmem>>, vector<1x1x8x1xf32>,
    return
  }
  func.func @transform_0(%arg0: i32, %arg1: i32, %arg2: i32) -> (i32, i32, i32) {
    %c1_i32 = arith.constant 1 : i32
    %0 = arith.muli %arg1, %c1_i32 : i32
    %1 = arith.addi %0, %arg2 : i32
    %c0_i32 = arith.constant 0 : i32
    %c0_i32_0 = arith.constant 0 : i32
    return %arg0, %c0_i32, %1 : i32, i32, i32
  }
  func.func @transform_1(%arg0: i32, %arg1: i32, %arg2: i32) -> (i32, i32, i32) {
    %c1_i32 = arith.constant 1 : i32
    %0 = arith.muli %arg1, %c1_i32 : i32
    %1 = arith.addi %0, %arg2 : i32
    %c1_i32_0 = arith.constant 1 : i32
    %2 = arith.addi %1, %c1_i32_0 : i32
    %c3_i32 = arith.constant 3 : i32
    %3 = arith.muli %2, %c3_i32 : i32
    %c0_i32 = arith.constant 0 : i32
    %c0_i32_1 = arith.constant 0 : i32
    return %arg0, %c0_i32, %3 : i32, i32, i32
  }
  func.func @transform_2(%arg0: i32, %arg1: i32, %arg2: i32) -> (i32, i32) {
    %c0_i32 = arith.constant 0 : i32
    %c0_i32_0 = arith.constant 0 : i32
    %c0_i32_1 = arith.constant 0 : i32
    return %c0_i32, %c0_i32_0 : i32, i32
  }
  func.func @transform_3(%arg0: i32, %arg1: i32, %arg2: i32) -> (i32, i32) {
    %c0_i32 = arith.constant 0 : i32
    %c0_i32_0 = arith.constant 0 : i32
    %c0_i32_1 = arith.constant 0 : i32
    return %c0_i32, %c0_i32_0 : i32, i32
  }
  func.func @transform_4(%arg0: i32, %arg1: i32, %arg2: i32) -> (i32, i32) {
    %c1_i32 = arith.constant 1 : i32
    %0 = arith.muli %arg1, %c1_i32 : i32
    %1 = arith.addi %0, %arg2 : i32
    %c0_i32 = arith.constant 0 : i32
    %c0_i32_0 = arith.constant 0 : i32
    return %c0_i32, %1 : i32, i32
  }
  func.func @transform_5(%arg0: i32, %arg1: i32, %arg2: i32) -> (i32, i32, i32) {
    %c1_i32 = arith.constant 1 : i32
    %0 = arith.muli %arg1, %c1_i32 : i32
    %1 = arith.addi %0, %arg2 : i32
    %c0_i32 = arith.constant 0 : i32
    %c0_i32_0 = arith.constant 0 : i32
    return %arg0, %c0_i32, %1 : i32, i32, i32
  }
  func.func @transform_6(%arg0: i32, %arg1: i32, %arg2: i32) -> (i32, i32, i32, i32) {
    %c0_i32 = arith.constant 0 : i32
    %c0_i32_0 = arith.constant 0 : i32
    %c0_i32_1 = arith.constant 0 : i32
    return %arg0, %arg1, %c0_i32, %c0_i32_0 : i32, i32, i32, i32
  }
  func.func @transform_7(%arg0: i32, %arg1: i32, %arg2: i32) -> (i32, i32, i32, i32) {
    %c0_i32 = arith.constant 0 : i32
    %c0_i32_0 = arith.constant 0 : i32
    %c0_i32_1 = arith.constant 0 : i32
    return %arg0, %arg1, %c0_i32, %c0_i32_0 : i32, i32, i32, i32
  }
}

</mosaic_0001>

<bundles_post_ra>
// kernel: tpu_custom_call.1
= control target key start
LH: loop header
LB: loop body
LE: loop exit
PB: predicated region body
PF: predicated region fallthrough
CT: control target
= control target key end

     0   :  { %s1864_s0 = inlined_call_operand.hbm [shape: f32[2,8,512], index: 0, kind: input, shape index: {}]   ;;  %s1865_s1 = inlined_call_operand.hbm [shape: f32[2,8,512], index: 1, kind: input, shape index: {}]   ;;  %s1866_s2 = inlined_call_operand.vmem [shape: f32[8,72], index: 2, kind: input, shape index: {}]   ;;  %s1867_s3 = inlined_call_operand.vmem [shape: f32[8,1], index: 3, kind: input, shape index: {}]   ;;  %s1868_s4 = inlined_call_operand.vmem [shape: f32[1,384], index: 4, kind: input, shape index: {}]   ;;  %s1869_s5 = inlined_call_operand.hbm [shape: f32[2,8,384], index: 5, kind: output, shape index: {0}]   ;;  %s1870_s6 = inlined_call_operand.vmem [shape: f32[2,1,8,1], index: 6, kind: output, shape index: {1}]   ;;  %s1871_s7 = inlined_call_operand.vmem [shape: f32[2,1,8,1], index: 7, kind: output, shape index: {2}]  }
   0x1   :  { %1877 = sst [smem:[#allocation15_spill]] %s1864_s0 }
   0x2   :  { %13 = vsyncpa [#allocation5], 0 }
   0x3   :  { %15 = vsyncpa [#allocation5 + $0x1], 0 }
   0x4   :  { %16 = vsyncpa [#allocation8], 0 }
   0x5   :  { %18 = vsyncpa [#allocation8 + $0x1], 0 }
   0x6   :  { %19 = vsyncpa [#allocation6], 0 }
   0x7   :  { %21 = vsyncpa [#allocation6 + $0x1], 0  ;;  %s1573_s24 = smov 0   ;;  %s1575_s25 = smov 0  }
   0x8   :  { %s1577_s26 = smov 0   ;;  %s1579_s27 = smov 0  }
   0x9   :  { %s1581_s28 = smov 0   ;;  %s1583_s29 = smov 0  }
   0xa LB: > { %1878 = sst [smem:[#allocation13_spill]] %s1512_s28  ;;  %s1136_s30 = sadd.s32 4294967295, %s1516_s29   ;;  %s1516_s29 = sphi %s1583_s29, %s27_s29   ;;  %s1512_s28 = sphi %s1581_s28, %s1895_s28   ;;  %s1508_s27 = sphi %s1579_s27, %s1894_s27   ;;  %s1504_s26 = sphi %s1577_s26, %s1898_s26   ;;  %s1500_s25 = sphi %s1575_s25, %s1897_s25   ;;  %s1496_s24 = sphi %s1573_s24, %s1896_s24  }
   0xb   : > { %s1137_s8 = sadd.s32 4294967294, %s1516_s29   ;;  %s46_s9 = sadd.s32 1, %s1512_s28 }
   0xc   : > { %s57_s10 = sadd.s32 1, %s1504_s26  ;;  %p48_p0 = scmp.ge.s32.totalorder %s46_s9, 2 }
   0xd   : > { %p64_p1 = scmp.ne.s32.totalorder %s1504_s26, %s1500_s25  ;;  %p65_p2 = scmp.eq.s32.totalorder %s1516_s29, 0 }
   0xe   : > { %p70_p3 = scmp.ne.s32.totalorder %s1500_s25, %s1496_s24  ;;  %s1900_s9 = smov (%p48_p0, %s46_s9), 0 }
   0xf   : > { %1879 = sst [smem:[#allocation14_spill]] %s1900_s9  ;;  %p1614_p4 = por %p65_p2, %p64_p1 }
  0x10   : > { %p71_p5 = scmp.eq.s32.totalorder %s1136_s30, 0  ;;  %s52_s12 = ssub.s32 %s1512_s28, %s1900_s9 }
  0x11   : > { %p202_p6 = scmp.eq.s32.totalorder %s1136_s30, 1  ;;  %p55_p7 = scmp.eq.s32.totalorder %s52_s12, 0 }
  0x12   : > { %p1620_p8 = por %p71_p5, %p70_p3  ;;  %p208_p10 = scmp.eq.s32.totalorder %s1137_s8, 1 }
  0x13   : > { %p1624_p9 = por %p202_p6, %p64_p1  ;;  %p1236_p13 = scmp.lt.s32.totalorder %s1516_s29, 2 }
  0x14   : > { %s1881_s13 = scalar_select %p1620_p8, 1, 0 }
  0x15   : > { %s1882_s14 = scalar_select %p1624_p9, 1, 0 }
  0x16   : > { %s1629_s15 = scalar_select %p55_p7, %s1504_s26, %s57_s10  }
  0x17   : > { %p1631_p11 = por %p208_p10, %p70_p3  ;;  %s1638_s17 = sand.u32 1, %s1504_s26  }
  0x18   : > { %s1216_s18 = smul.u32 24, %s1638_s17  ;;  %s1872_s19 = sshll.u32 %s1512_s28, 9 }
  0x19   : > { %s1883_s16 = scalar_select %p1631_p11, 1, 0 }
  0x1a   : > { %p1644_p0 = pnand %p1236_p13, %p1614_p4  ;;  %s1885_s0 = sld [smem:[#allocation15_spill]] }
  0x1b   : > { %s304_s30 = scalar_lea.vmem [#allocation4], %s1216_s18  ;;  %s301_s10 = scalar_lea.sflag [#allocation5], %s1638_s17 }
  0x1c   : > { %s321_s8 = sshll.u32 %s304_s30, 4  ;;  %p1371_p3 = pneg %p1644_p0  ;;  %s1655_s8 = int_to_ptr.vmem [resolvable:$true] %s321_s8 }
  0x20   : > { %s1653_s23 = scalar_lea.hbm %s1885_s0, %s1872_s19  ;;  %s1374_s22 = scalar_lea.hbm %s1885_s0, 1024 }
  0x21   : > { %s1369_s11 = scalar_lea.hbm %s1653_s23, 384  ;;  %p1375_p6 = scmp.lt.u32.totalorder %s1653_s23, %s1885_s0 }
  0x22   : > { %p1370_p2 = scmp.ne.s32.totalorder %s1653_s23, %s1369_s11  ;;  %p1376_p7 = scmp.lt.u32.totalorder %s1374_s22, %s1369_s11 }
  0x23   : > { %p1378_p13 = scmp.lt.u32.totalorder %s1369_s11, %s1653_s23 }
  0x24   : > { %p1372_p4 = pnand %p1371_p3, %p1370_p2  ;;  %p1377_p10 = por %p1376_p7, %p1375_p6 }
  0x26   : > { %p1373_p5 = pneg %p1372_p4  ;;  %p1379_p12 = por %p1378_p13, %p1377_p10 }
  0x28   : > { %p1380_p1 = pnand %p1379_p12, %p1373_p5 }
  0x2a   : > { %1383 = shalt.err (!%p1380_p1)
}
  0x2b   : > { %s1384_s18 = scalar_lea.vmem %s1655_s8, 384  ;;  %s1518_s30 = smov [#allocation4]  }
  0x2c   : > { %p1385_p2 = scmp.ne.s32.totalorder %s1655_s8, %s1384_s18  ;;  %s1389_s12 = sshll.u32 %s1518_s30, 4  ;;  %s1390_s12 = int_to_ptr.vmem [resolvable:$false] %s1389_s12 }
  0x2d   : > { %s1391_s9 = scalar_lea.vmem %s1390_s12, 768  ;;  %p1392_p9 = scmp.lt.s32.totalorder %s1655_s8, %s1390_s12 }
  0x2e   : > { %p1387_p4 = pnand %p1385_p2, %p1371_p3  ;;  %p1393_p6 = scmp.lt.s32.totalorder %s1391_s9, %s1384_s18 }
  0x30   : > { %p1388_p11 = pneg %p1387_p4  ;;  %p1394_p7 = por %p1393_p6, %p1392_p9 }
  0x32   : > { %p1395_p10 = pnand %p1394_p7, %p1388_p11 }
  0x34   : > { %1398 = shalt.err (!%p1395_p10)
}
  0x35   : > { %1228 = dma.hbm_to_vmem [thread:$0]  (!%p1644_p0), %s1653_s23, 384, %s1655_s8, %s301_s10  }
  0x36   : > { %p349_p12 = scmp.lt.s32.totalorder %s1516_s29, 3  ;;  %s1143_s19 = sshll.u32 %s1638_s17, 3 }
  0x37   : > { %s1886_s11 = sshll.u32 %s1512_s28, 9  ;;  %p1887_p9 = scmp.ge.s32.totalorder %s1516_s29, 1 }
  0x38   : > { %s1010_s18 = scalar_lea.hbm %s1865_s1, %s1886_s11  ;;  %s332_s9 = scalar_lea.vmem [#allocation7], %s1143_s19 }
  0x39   : > { %p1693_p11 = pnand %p1887_p9, %p349_p12  ;;  %s1697_s12 = scalar_lea.hbm %s1010_s18, 384 }
  0x3a   : > { %s344_s0 = sshll.u32 %s332_s9, 4  ;;  %s329_s23 = scalar_lea.sflag [#allocation8], %s1638_s17  ;;  %s345_s0 = int_to_ptr.vmem [resolvable:$true] %s344_s0 }
  0x3b   : > { %s1888_s30 = scalar_select %p1693_p11, 1, 0 }
  0x3c   : > { %s1429_s8 = scalar_lea.hbm %s1010_s18, 512  ;;  %s1404_s21 = scalar_lea.hbm %s1865_s1, 1024 }
  0x3d   : > { %p1400_p1 = scmp.ne.s32.totalorder %s1697_s12, %s1429_s8  ;;  %p1405_p2 = scmp.lt.u32.totalorder %s1697_s12, %s1865_s1 }
  0x3e   : > { %p1406_p4 = scmp.lt.u32.totalorder %s1404_s21, %s1429_s8  ;;  %p1408_p7 = scmp.lt.u32.totalorder %s1429_s8, %s1697_s12 }
  0x3f   : > { %p1402_p5 = pnand %p1400_p1, %p1371_p3 }
  0x40   : > { %p1407_p6 = por %p1406_p4, %p1405_p2 }
  0x41   : > { %p1403_p13 = pneg %p1402_p5 }
  0x42   : > { %p1409_p10 = por %p1408_p7, %p1407_p6 }
  0x44   : > { %p1410_p12 = pnand %p1409_p10, %p1403_p13 }
  0x46   : > { %1413 = shalt.err (!%p1410_p12)
}
  0x47   : > { %s1414_s17 = scalar_lea.vmem %s345_s0, 128  ;;  %s1519_s19 = smov [#allocation7]  }
  0x48   : > { %p1415_p9 = scmp.ne.s32.totalorder %s345_s0, %s1414_s17  ;;  %s1419_s18 = sshll.u32 %s1519_s19, 4  ;;  %s1420_s18 = int_to_ptr.vmem [resolvable:$false] %s1419_s18 }
  0x49   : > { %s1421_s9 = scalar_lea.vmem %s1420_s18, 256  ;;  %p1422_p8 = scmp.lt.s32.totalorder %s345_s0, %s1420_s18 }
  0x4a   : > { %p1417_p1 = pnand %p1415_p9, %p1371_p3  ;;  %p1423_p11 = scmp.lt.s32.totalorder %s1421_s9, %s1414_s17 }
  0x4c   : > { %p1418_p5 = pneg %p1417_p1  ;;  %p1424_p2 = por %p1423_p11, %p1422_p8 }
  0x4e   : > { %p1425_p4 = pnand %p1424_p2, %p1418_p5 }
  0x50   : > { %1428 = shalt.err (!%p1425_p4)
}
  0x51   : > { %1231 = dma.hbm_to_vmem [thread:$0]  (!%p1644_p0), %s1697_s12, 128, %s345_s0, %s329_s23  }
  0x52   : > { %p1889_p13 = scmp.ne.s32.totalorder %s1888_s30, 0 }
  0x53   : > { %s1721_s28 = sand.u32 (!%p1889_p13), 1, %s1500_s25   ;;  %p1890_p8 = scmp.ne.s32.totalorder (!%p1889_p13), %s1881_s13, 0 }
  0x54   : > { %353 = sbr.rel (%p1889_p13) target bundleno = 633 (0x279), region = 40  ;;  %s356_s10 = scalar_lea.sflag (!%p1889_p13), [#allocation5], %s1721_s28 }
  0x55   : > { %s1217_s8 = smul.u32 (!%p1889_p13), 24, %s1721_s28 }
  0x57   : > { %s359_s11 = scalar_lea.vmem (!%p1889_p13), [#allocation4], %s1217_s8 }
  0x5b   : > { %1483 = dma.done.wait (%p1890_p8), %s356_s10, 384  }
  0x5c   : > { %1485 = vsyncadd (%p1890_p8), %s356_s10, 4294966912  ;;  %s1147_s0 = sshll.u32 %s1721_s28, 3  ;;  %s365_s20 = scalar_lea.sflag [#allocation8], %s1721_s28 }
  0x5d   : > { %s368_s30 = scalar_lea.vmem [#allocation7], %s1147_s0 }
  0x5e   : > { %1487 = dma.done.wait (%p1890_p8), %s365_s20, 128  }
  0x5f   : > { %1489 = vsyncadd (%p1890_p8), %s365_s20, 4294967168  ;;  %v1520_v0 = vmov 0.0|0.0   ;;  %v456_v1 = vld [vmem:[%s359_s11 + $0x8] sm:$0xff]  ;;  %v1738_v2 = vld [vmem:[%s359_s11 + $0x10] sm:$0xff]  ;;  %s1521_s12 = smov 126   ;;  %s1522_s23 = smov 127  }
  0x60   : > { %1204 = vmatprep.subr.bf16.mxu1 %v1520_v0  ;;  %v1740_v3 = vld [vmem:[%s359_s11] sm:$0xff]  ;;  %v1308_v4 = vpack.i.bf16 %v1738_v2, %v456_v1  ;;  %s1523_s21 = smov 110   ;;  %s1524_s13 = smov 108   ;;  %v1526_v7 = vmov 0.0   ;;  %vm1529_vm0 = vmmov 0   ;;  %vm485_vm1 = vcmask 1039360  }
  0x61   : > { %v461_v5 = vld [vmem:[%s368_s30] sm:$0xff]  ;;  %s1525_s22 = smov 109   ;;  %773 = vmatprep.mubr.f32.mxu0 %v1526_v7  ;;  %s1527_s17 = smov 91   ;;  %1185 = vmatprep.mubr.msk.f32.mxu1 %vm1529_vm0, %v1526_v7  ;;  %vm511_vm2 = vcmask 1031168   ;;  %vm537_vm3 = vcmask 900096   ;;  %vm563_vm4 = vcmask 891904  }
  0x62   : > { %1309 = vrot.lane.b32.xlu1 %v1308_v4, %s1521_s12  ;;  %1299 = vrot.lane.b32.xlu0 %v1308_v4, %s1522_s23  ;;  %v1303_v6 = vpack.i.bf16 %v461_v5, %v1740_v3  ;;  %s1528_s19 = smov 92   ;;  %s1530_s18 = smov 90   ;;  %vm589_vm5 = vcmask 883712   ;;  %vm615_vm6 = vcmask 752640   ;;  %vm641_vm7 = vcmask 744448  }
  0x63   : > { %vm667_vm8 = vcmask 736256   ;;  %vm705_vm9 = vcmask 588800   ;;  %p441_p0 = scmp.lt.s32.totalorder %s1508_s27, 1  ;;  %vm897_vm10 = vcmask 7168   ;;  %s1218_s9 = smul.u32 384, %s1508_s27 }
  0x64   : > { %s404_s10 = scalar_lea.vmem [#allocation9], %s1217_s8  ;;  %p1891_p11 = scmp.ne.s32.totalorder %s1882_s14, 0 }
  0x65   : > { %s1783_s11 = scalar_select %p441_p0, %s1508_s27, 1 }
  0x66   : > { %1314 = vrot.lane.b32.xlu1 %v1308_v4, %s1523_s21  ;;  %1304 = vrot.lane.b32.xlu0 %v1303_v6, %s1522_s23  ;;  %s1815_s30 = scalar_lea.hbm %s1869_s5, %s1218_s9  ;;  %s908_s27 = scalar_lea.sflag [#allocation6], %s1721_s28 }
  0x67   : > { %s1148_s0 = sshll.u32 %s1783_s11, 3  ;;  %s939_s11 = sshll.u32 %s404_s10, 4  ;;  %s1817_s11 = int_to_ptr.vmem [resolvable:$true] %s939_s11 }
  0x68   : > { %s1430_s8 = scalar_lea.vmem %s1817_s11, 384 }
  0x69   : > { %p1431_p3 = scmp.ne.s32.totalorder %s1817_s11, %s1430_s8 }
  0x6a   : > { %1324 = vrot.lane.b32.xlu1 %v1303_v6, %s1523_s21  ;;  %1319 = vrot.lane.b32.xlu0 %v1303_v6, %s1521_s12  ;;  %s1789_s12 = scalar_lea.vmem %s1870_s6, %s1148_s0 }
  0x6b   : > { %898 = vst.msk [vmem:[%s1789_s12] sm:$0xff] %vm897_vm10, %v1526_v7  ;;  %p1432_p6 = pnand %p1431_p3, %p1891_p11 }
  0x6d   : > { %p1433_p7 = pneg %p1432_p6 }
  0x6e   : > { %1334 = vrot.lane.b32.xlu1 %v1308_v4, %s1524_s13  ;;  %1329 = vrot.lane.b32.xlu0 %v1308_v4, %s1525_s22 }
  0x72   : > { %1344 = vrot.lane.b32.xlu1 %v1303_v6, %s1524_s13  ;;  %1339 = vrot.lane.b32.xlu0 %v1303_v6, %s1525_s22 }
  0x76   : > { %1354 = vrot.lane.b32.xlu1 %v1308_v4, %s1527_s17  ;;  %1349 = vrot.lane.b32.xlu0 %v1308_v4, %s1528_s19 }
  0x7a   : > { %1364 = vrot.lane.b32.xlu1 %v1303_v6, %s1527_s17  ;;  %1359 = vrot.lane.b32.xlu0 %v1303_v6, %s1528_s19  ;;  %s454_s17 = scalar_lea.vmem %s1871_s7, %s1148_s0 }
  0x7b   : > { %899 = vst.msk [vmem:[%s454_s17] sm:$0xff] %vm897_vm10, %v1526_v7 }
  0x7e   : > { %663 = vrot.lane.b32.xlu1 %v1738_v2, %s1530_s18  ;;  %661 = vrot.lane.b32.xlu0 %v456_v1, %s1530_s18 }
  0x82   : > { %665 = vrot.lane.b32.xlu1 %v461_v5, %s1530_s18  ;;  %659 = vrot.lane.b32.xlu0 %v1740_v3, %s1530_s18 }
  0xd4   : > { %v1310_v8 = vpop.permute.xlu1 %1309  ;;  %v1300_v9 = vpop.permute.xlu0 %1299 }
  0xd5   : > { %v1302_v10 = vunpack.i.h.bf16 %v1300_v9  ;;  %v1301_v11 = vunpack.i.l.bf16 %v1300_v9  ;;  %v1312_v12 = vunpack.i.h.bf16 %v1310_v8  ;;  %v1311_v13 = vunpack.i.l.bf16 %v1310_v8 }
  0xd7   : > { %v487_v14 = vsel %vm485_vm1, %v1301_v11, %v1302_v10  ;;  %v513_v24 = vsel %vm511_vm2, %v1311_v13, %v1312_v12 }
  0xd8   : > { %v1315_v15 = vpop.permute.xlu1 %1314  ;;  %v1305_v16 = vpop.permute.xlu0 %1304  ;;  %v1188_v17 = vpack.c.bf16 %v487_v14, %v456_v1 }
  0xd9   : > { %v1317_v18 = vunpack.i.h.bf16 %v1315_v15  ;;  %v1316_v19 = vunpack.i.l.bf16 %v1315_v15  ;;  %v1307_v20 = vunpack.i.h.bf16 %v1305_v16  ;;  %v1306_v21 = vunpack.i.l.bf16 %v1305_v16 }
  0xda   : > { %1189 = vmatprep.subr.bf16.mxu0 %v1188_v17 }
  0xdb   : > { %v486_v22 = vsel %vm485_vm1, %v1306_v21, %v1301_v11  ;;  %v488_v23 = vsel %vm485_vm1, %v1302_v10, %v1307_v20  ;;  %v539_v25 = vsel %vm537_vm3, %v1316_v19, %v1317_v18 }
  0xdc   : > { %v1325_v26 = vpop.permute.xlu1 %1324  ;;  %v1320_v27 = vpop.permute.xlu0 %1319  ;;  %v1190_v28 = vpack.c.bf16 %v486_v22, %v1740_v3  ;;  %v1205_v29 = vpack.c.bf16 %v488_v23, %v1738_v2  ;;  %v1192_v30 = vpack.c.bf16 %v539_v25, %v513_v24  ;;  %v677_v25 = vld [vmem:[%s1866_s2] sm:$0xff] }
  0xdd   : > { %v1327_v31 = vunpack.i.h.bf16 %v1325_v26  ;;  %v1326_v32 = vunpack.i.l.bf16 %v1325_v26  ;;  %v1322_v33 = vunpack.i.h.bf16 %v1320_v27  ;;  %v1321_v34 = vunpack.i.l.bf16 %v1320_v27 }
  0xde   : > { %1191 = vmatpush1.bf16.msra.mxu0 %v1190_v28  ;;  %1206 = vmatpush3.bf16.msra.mxu1 %v1205_v29  ;;  %v1531_v28 = vmov 0   ;;  %v864_v29 = vlaneseq }
  0xdf   : > { %1193 = vmatprep.subr.bf16.mxu0 %v1192_v30  ;;  %1207 = vmatprep.subr.bf16.mxu1 %v1520_v0  ;;  %v512_v35 = vsel %vm511_vm2, %v1321_v34, %v1311_v13  ;;  %v538_v36 = vsel %vm537_vm3, %v1326_v32, %v1316_v19  ;;  %v514_v37 = vsel %vm511_vm2, %v1312_v12, %v1322_v33  ;;  %v862_v32 = vld [vmem:[%s1868_s4] sm:$0x7] }
  0xe0   : > { %v1335_v38 = vpop.permute.xlu1 %1334  ;;  %v1330_v39 = vpop.permute.xlu0 %1329  ;;  %v1194_v40 = vpack.c.bf16 %v538_v36, %v512_v35  ;;  %v540_v41 = vsel %vm537_vm3, %v1317_v18, %v1327_v31  ;;  %1368 = vset.pattern.permute.xlu0 %v1531_v28  ;;  %v865_v30 = vshrl.u32 %v864_v29, 7 }
  0xe1   : > { %v1337_v42 = vunpack.i.h.bf16 %v1335_v38  ;;  %v1336_v43 = vunpack.i.l.bf16 %v1335_v38  ;;  %v1332_v44 = vunpack.i.h.bf16 %v1330_v39  ;;  %v1331_v45 = vunpack.i.l.bf16 %v1330_v39 }
  0xe2   : > { %1195 = vmatpush1.bf16.msra.mxu0 %v1194_v40  ;;  %v1208_v46 = vpack.c.bf16 %v540_v41, %v514_v37  ;;  %v866_v31 = vsub.s32 0, %v865_v30  ;;  %v870_v33 = vsub.s32 1, %v865_v30  ;;  %v874_v34 = vsub.s32 2, %v865_v30 }
  0xe3   : > { %v565_v47 = vsel %vm563_vm4, %v1331_v45, %v1332_v44  ;;  %v591_v48 = vsel %vm589_vm5, %v1336_v43, %v1337_v42 }
  0xe4   : > { %1209 = vmatpush3.bf16.msra.mxu1 %v1208_v46  ;;  %v1345_v49 = vpop.permute.xlu1 %1344  ;;  %v1340_v50 = vpop.permute.xlu0 %1339  ;;  %v1196_v51 = vpack.c.bf16 %v591_v48, %v565_v47  ;;  %v867_v35 = vrot.slane %v862_v32, %v866_v31  ;;  %v871_v36 = vrot.slane %v862_v32, %v870_v33  ;;  %v875_v37 = vrot.slane %v862_v32, %v874_v34 }
  0xe5   : > { %v1347_v52 = vunpack.i.h.bf16 %v1345_v49  ;;  %v1346_v53 = vunpack.i.l.bf16 %v1345_v49  ;;  %v1342_v54 = vunpack.i.h.bf16 %v1340_v50  ;;  %v1341_v55 = vunpack.i.l.bf16 %v1340_v50  ;;  %1210 = vmatprep.subr.bf16.mxu1 %v1520_v0 }
  0xe6   : > { %1197 = vmatprep.subr.bf16.mxu0 %v1196_v51 }
  0xe7   : > { %v564_v56 = vsel %vm563_vm4, %v1341_v55, %v1331_v45  ;;  %v590_v57 = vsel %vm589_vm5, %v1346_v53, %v1336_v43  ;;  %v566_v58 = vsel %vm563_vm4, %v1332_v44, %v1342_v54  ;;  %v592_v59 = vsel %vm589_vm5, %v1337_v42, %v1347_v52  ;;  %v850_v52 = vld [vmem:[%s1867_s3] sm:$0xff] }
  0xe8   : > { %v1355_v60 = vpop.permute.xlu1 %1354  ;;  %v1350_v61 = vpop.permute.xlu0 %1349  ;;  %v1198_v62 = vpack.c.bf16 %v590_v57, %v564_v56  ;;  %v1211_v63 = vpack.c.bf16 %v592_v59, %v566_v58  ;;  %v900_v53 = vld [vmem:[%s1789_s12] sm:$0xff] }
  0xe9   : > { %v1357_v1 = vunpack.i.h.bf16 %v1355_v60  ;;  %v1356_v2 = vunpack.i.l.bf16 %v1355_v60  ;;  %v1352_v3 = vunpack.i.h.bf16 %v1350_v61  ;;  %v1351_v4 = vunpack.i.l.bf16 %v1350_v61  ;;  %v904_v55 = vld [vmem:[%s454_s17] sm:$0xff] }
  0xea   : > { %1199 = vmatpush1.bf16.msra.mxu0 %v1198_v62  ;;  %1212 = vmatpush3.bf16.msra.mxu1 %v1211_v63 }
  0xeb   : > { %v617_v5 = vsel %vm615_vm6, %v1351_v4, %v1352_v3  ;;  %v643_v6 = vsel %vm641_vm7, %v1356_v2, %v1357_v1  ;;  %1213 = vmatprep.subr.bf16.mxu1 %v1520_v0 }
  0xec   : > { %v1365_v8 = vpop.permute.xlu1 %1364  ;;  %v1360_v9 = vpop.permute.xlu0 %1359  ;;  %v1200_v10 = vpack.c.bf16 %v643_v6, %v617_v5 }
  0xed   : > { %v1367_v11 = vunpack.i.h.bf16 %v1365_v8  ;;  %v1366_v12 = vunpack.i.l.bf16 %v1365_v8  ;;  %v1362_v13 = vunpack.i.h.bf16 %v1360_v9  ;;  %v1361_v14 = vunpack.i.l.bf16 %v1360_v9 }
  0xee   : > { %1201 = vmatprep.subr.bf16.mxu0 %v1200_v10 }
  0xef   : > { %v616_v15 = vsel %vm615_vm6, %v1361_v14, %v1351_v4  ;;  %v642_v16 = vsel %vm641_vm7, %v1366_v12, %v1356_v2  ;;  %v618_v17 = vsel %vm615_vm6, %v1352_v3, %v1362_v13  ;;  %v644_v18 = vsel %vm641_vm7, %v1357_v1, %v1367_v11 }
  0xf0   : > { %v664_v19 = vpop.permute.xlu1 %663  ;;  %v662_v20 = vpop.permute.xlu0 %661  ;;  %v1202_v0 = vpack.c.bf16 %v642_v16, %v616_v15  ;;  %v1214_v21 = vpack.c.bf16 %v644_v18, %v618_v17 }
  0xf1   : > { %v669_v22 = vsel %vm667_vm8, %v662_v20, %v664_v19 }
  0xf2   : > { %1203 = vmatpush1.bf16.msra.mxu0 %v1202_v0  ;;  %1215 = vmatpush3.bf16.msra.mxu1 %v1214_v21 }
  0xf3   : > { %725 = vmatprep.subr.mxu0 %v669_v22  ;;  %1183 = vmatprep.subr.mxu1 %v1526_v7 }
  0xf4   : > { %v666_v23 = vpop.permute.xlu1 %665  ;;  %v660_v24 = vpop.permute.xlu0 %659 }
  0xf5   : > { %v668_v26 = vsel %vm667_vm8, %v660_v24, %v662_v20  ;;  %v670_v27 = vsel %vm667_vm8, %v664_v19, %v666_v23 }
  0xf6   : > { %726 = vmatpush1.msra.mxu0 %v668_v26  ;;  %1184 = vmatpush3.msra.mxu1 %v670_v27 }
  0xf7   : > { %1150 = vmatmul.mubr.msk.f32.vlgmr.msra.gmra.mrb[0].mxu0 %vm705_vm9, %v677_v25  ;;  %1186 = vmatmul.mubr.msk.f32.vlgmr.msra.gmra.mrb[0].mxu1 %vm705_vm9, %v677_v25 }
 0x1ca   : > { %v775_v38 = vpop.f32.mrb[0].mxu0  ;;  %v846_v39 = vpop.f32.mrb[0].mxu1 }
 0x1cb   : > { %v879_v40 = vmul.f32 %v867_v35, %v775_v38  ;;  %v777_v41 = vpop.f32.mrb[1].mxu0  ;;  %v1187_v42 = vpop.f32.mrb[1].mxu1  ;;  %v881_v44 = vmul.f32 %v875_v37, %v846_v39 }
 0x1cc   : > { %v880_v43 = vmul.f32 %v871_v36, %v777_v41 }
 0x1cd   : > { %v886_v45 = vmul.f32 %v879_v40, %v775_v38  ;;  %v888_v49 = vmul.f32 %v881_v44, %v846_v39 }
 0x1ce   : > { %v887_v46 = vmul.f32 %v880_v43, %v777_v41  ;;  %v882_v47 = vadd.f32 %v880_v43, %v879_v40 }
 0x1d0   : > { %v883_v48 = vadd.f32 %v882_v47, %v881_v44  ;;  %v889_v50 = vadd.f32 %v887_v46, %v886_v45 }
 0x1d2   : > { %884 = vadd.xlane.f32.xlu0 %v883_v48  ;;  %v890_v51 = vadd.f32 %v889_v50, %v888_v49 }
 0x1d4   : > { %891 = vadd.xlane.f32.xlu1 %v890_v51 }
 0x1e8   : > { %853 = vperm.xlu0 %1368, %v850_v52  }
 0x25f   : > { %v885_v54 = vpop.xlane.xlu0 %884 }
 0x260   : > { %v901_v56 = vadd.f32 %v900_v53, %v885_v54 }
 0x261   : > { %v892_v57 = vpop.xlane.xlu1 %891 }
 0x262   : > { %903 = vst.msk [vmem:[%s1789_s12] sm:$0xff] %vm897_vm10, %v901_v56  ;;  %v905_v58 = vadd.f32 %v904_v55, %v892_v57  ;;  %s1532_s12 = smov [#allocation9]  }
 0x263   : > { %s1434_s23 = sshll.u32 %s1532_s12, 4  ;;  %s1435_s23 = int_to_ptr.vmem [resolvable:$false] %s1434_s23 }
 0x264   : > { %906 = vst.msk [vmem:[%s454_s17] sm:$0xff] %vm897_vm10, %v905_v58  ;;  %s1436_s21 = scalar_lea.vmem %s1435_s23, 768  ;;  %p1437_p10 = scmp.lt.s32.totalorder %s1817_s11, %s1435_s23 }
 0x265   : > { %p1438_p12 = scmp.lt.s32.totalorder %s1436_s21, %s1430_s8 }
 0x267   : > { %v854_v7 = vpop.permute.xlu0 %853  ;;  %p1439_p9 = por %p1438_p12, %p1437_p10 }
 0x268   : > { %v856_v59 = vadd.f32 %v854_v7, %v775_v38  ;;  %v857_v60 = vadd.f32 %v854_v7, %v777_v41  ;;  %v858_v61 = vadd.f32 %v854_v7, %v846_v39 }
 0x269   : > { %p1440_p1 = pnand %p1439_p9, %p1433_p7 }
 0x26a   : > { %859 = vst [vmem:[%s404_s10] sm:$0xff] %v856_v59  ;;  %860 = vst [vmem:[%s404_s10 + $0x8] sm:$0xff] %v857_v60 }
 0x26b   : > { %861 = vst [vmem:[%s404_s10 + $0x10] sm:$0xff] %v858_v61 }
 0x26c   : > { %1443 = shalt.err (!%p1440_p1)
}
 0x26d   : > { %s1444_s28 = scalar_lea.hbm %s1815_s30, 384  ;;  %s1448_s17 = scalar_lea.hbm %s1869_s5, 768 }
 0x26e   : > { %p1445_p5 = scmp.ne.s32.totalorder %s1815_s30, %s1444_s28  ;;  %p1449_p13 = scmp.lt.u32.totalorder %s1815_s30, %s1869_s5 }
 0x26f   : > { %p1450_p8 = scmp.lt.u32.totalorder %s1448_s17, %s1444_s28  ;;  %p1452_p3 = scmp.lt.u32.totalorder %s1444_s28, %s1815_s30 }
 0x270   : > { %p1446_p2 = pnand %p1445_p5, %p1891_p11 }
 0x271   : > { %p1451_p0 = por %p1450_p8, %p1449_p13 }
 0x272   : > { %p1447_p4 = pneg %p1446_p2 }
 0x273   : > { %p1453_p6 = por %p1452_p3, %p1451_p0 }
 0x275   : > { %p1454_p7 = pnand %p1453_p6, %p1447_p4 }
 0x277   : > { %1457 = shalt.err (!%p1454_p7)
}
 0x278   : > { %1223 = dma.vmem_to_hbm [thread:$0]  (%p1891_p11), %s1817_s11, 384, %s1815_s30, %s908_s27  }
 0x279 PF: > { %s957_s9 = sand.u32 1, %s1496_s24   ;;  %p1892_p10 = scmp.ne.s32.totalorder %s1883_s16, 0 }
 0x27a   : > { %p1893_p12 = scmp.ge.s32.totalorder %s1516_s29, 2  ;;  %s958_s10 = scalar_lea.sflag [#allocation6], %s957_s9 }
 0x27c   : > { %p1233_p9 = pnand %p1893_p12, %p1892_p10 }
 0x27e   : > { %1491 = dma.done.wait (!%p1233_p9), %s958_s10, 384  }
 0x27f   : > { %1493 = vsyncadd (!%p1233_p9), %s958_s10, 4294966912  ;;  %s27_s29 = sadd.s32 1, %s1516_s29   ;;  %s1894_s27 = sld [smem:[#allocation13_spill]] }
 0x280   : > { %p24_p1 = scmp.ge.s32.totalorder %s27_s29, 4   ;;  %s1895_s28 = sld [smem:[#allocation14_spill]] }
 0x281   : > { %s1896_s24 = smov %s1500_s25  ;;  %s1897_s25 = smov %s1504_s26 }
 0x282   : > { %s1898_s26 = smov %s1629_s15  ;;  %26 = sbr.rel (!%p24_p1) target bundleno = 10 (0xa), region = 129 }
 0x289   :  { %983 = vsyncpa [#allocation5], 1 }
 0x28a   :  { %985 = vsyncpa [#allocation5 + $0x1], 1 }
 0x28b   :  { %986 = vsyncpa [#allocation8], 1 }
 0x28c   :  { %988 = vsyncpa [#allocation8 + $0x1], 1 }
 0x28d   :  { %989 = vsyncpa [#allocation6], 1 }
 0x28e   :  { %991 = vsyncpa [#allocation6 + $0x1], 1 }

</bundles_post_ra>
